<compile_context>
chip_gen: v7x
topology: tpu7x:2x2x1
jax: 0.10.0
libtpu: 0.0.40
codegen_flags: <defaults>
</compile_context>

<pallas_src>
import jax
import jax.numpy as jnp
from jax.experimental import pallas as pl
from jax.experimental.pallas import tpu as pltpu

_BN_EPS = 1e-5


def _sent2featmap_kernel(x_ref, w_ref, gamma_ref, beta_ref, o_ref, acc_ref):
    # x_ref:     (B, tile_k)       K-slice of the inputs
    # w_ref:     (tile_k, tile_n)  (K, N) tile of the weight
    # gamma_ref: (1, tile_n)       BN affine weight
    # beta_ref:  (1, tile_n)       BN affine bias
    # o_ref:     (B, tile_n)       output tile
    # acc_ref:   (B, tile_n) f32   matmul accumulator (VMEM scratch)
    k = pl.program_id(1)

    @pl.when(k == 0)
    def _():
        acc_ref[...] = jnp.zeros_like(acc_ref)

    # Linear (no bias: BN mean-subtraction cancels it exactly).  Operands stay
    # in their native dtype; accumulation is f32 on the MXU.
    acc_ref[...] += jnp.dot(
        x_ref[...], w_ref[...], preferred_element_type=jnp.float32
    )

    @pl.when(k == pl.num_programs(1) - 1)
    def _():
        # BatchNorm1d (training forward): per-feature stats over the batch.
        y = acc_ref[...]                                        # (B, tile_n) f32
        mean = jnp.mean(y, axis=0, keepdims=True)               # (1, tile_n)
        diff = y - mean
        var = jnp.mean(diff * diff, axis=0, keepdims=True)      # biased var
        inv_std = jax.lax.rsqrt(var + _BN_EPS)
        scale = gamma_ref[...].astype(jnp.float32) * inv_std    # (1, tile_n)
        shift = beta_ref[...].astype(jnp.float32) - mean * scale
        # activ is None by default -> no activation.
        o_ref[...] = (y * scale + shift).astype(o_ref.dtype)


def _pick_tile_n(out_dim, in_dim, batch, x_itemsize, w_itemsize,
                 vmem_budget_bytes=20 * 1024 * 1024):
    """Largest column tile that (a) divides out_dim, (b) leaves >=2 grid steps
    (so v7x can use both TensorCores), (c) fits a conservative VMEM budget that
    is safe on v5e/v6e/v7x."""
    def est_bytes(tn, tk):
        return (2 * tk * tn * w_itemsize          # double-buffered W tile
                + 2 * batch * tk * x_itemsize     # double-buffered x tile
                + 2 * batch * tn * 4              # double-buffered f32 output
                + batch * tn * 4                  # f32 accumulator scratch
                + 4 * 2 * tn * 4)                 # gamma/beta tiles
    tk = min(in_dim, 2048)
    best = None
    for cand in (1024, 512, 256, 128):
        if out_dim % cand != 0:
            continue
        if est_bytes(cand, tk) > vmem_budget_bytes:
            continue
        if best is None:
            best = cand
        if out_dim // cand >= 2:
            return cand
    if best is not None:
        return best
    return out_dim  # tiny out_dim: single full-width step


def sent2featmap(x, weight, bias, gamma, beta, *, row, col, channel,
                 tile_n=None, tile_k=None):
    """x: (B, in_dim); weight: (in_dim, out_dim); bias/gamma/beta: (out_dim,).

    Returns (B, channel, row, col) in NCHW order, matching the PyTorch module.
    `bias` is accepted for interface parity but not used: BatchNorm's mean
    subtraction cancels the Linear bias exactly (float-rounding-level diff).
    """
    del bias  # cancelled by BN mean subtraction
    B, in_dim = x.shape
    out_dim = row * col * channel
    assert weight.shape == (in_dim, out_dim)

    if tile_n is None:
        tile_n = _pick_tile_n(out_dim, in_dim, B,
                              x.dtype.itemsize, weight.dtype.itemsize)
    assert out_dim % tile_n == 0, "out_dim must be a multiple of tile_n"

    if tile_k is None:
        tile_k = in_dim if in_dim <= 2048 else 1024
    assert in_dim % tile_k == 0, "in_dim must be a multiple of tile_k"

    n_j = out_dim // tile_n
    n_k = in_dim // tile_k

    g2 = gamma.reshape(1, out_dim)
    be2 = beta.reshape(1, out_dim)

    y = pl.pallas_call(
        _sent2featmap_kernel,
        out_shape=jax.ShapeDtypeStruct((B, out_dim), jnp.float32),
        grid_spec=pltpu.PrefetchScalarGridSpec(
            num_scalar_prefetch=0,
            grid=(n_j, n_k),  # reduction (K) axis last
            in_specs=[
                pl.BlockSpec((B, tile_k), lambda j, k: (0, k)),        # x
                pl.BlockSpec((tile_k, tile_n), lambda j, k: (k, j)),   # W tile
                pl.BlockSpec((1, tile_n), lambda j, k: (0, j)),        # gamma
                pl.BlockSpec((1, tile_n), lambda j, k: (0, j)),        # beta
            ],
            out_specs=pl.BlockSpec((B, tile_n), lambda j, k: (0, j)),
            scratch_shapes=[pltpu.VMEM((B, tile_n), jnp.float32)],
        ),
        compiler_params=pltpu.CompilerParams(
            dimension_semantics=("parallel", "arbitrary"),
            # Explicit limit: v5e's default scoped limit is only 16 MiB; this
            # stays comfortably under v7x's 64 MiB physical VMEM.
            vmem_limit_bytes=32 * 1024 * 1024,
        ),
    )(x, weight, g2, be2)

    # .view(-1, channel, row, col)
    return y.reshape(B, channel, row, col)


if __name__ == "__main__":
    # Small shapes consistent with the module's forward:
    #   inputs: (B, in_dim); out_dim = row * col * channel
    B = 2
    in_dim = 32
    row, col, channel = 16, 16, 4
    out_dim = row * col * channel  # 1024

    key = jax.random.PRNGKey(0)
    kx, kw, kb, kg, kbe = jax.random.split(key, 5)

    x = jax.random.normal(kx, (B, in_dim), dtype=jnp.float32)
    # Deterministic parameter init (synthetic, not a checkpoint load).
    weight = jax.random.normal(kw, (in_dim, out_dim), dtype=jnp.float32) * 0.05
    bias = jax.random.normal(kb, (out_dim,), dtype=jnp.float32) * 0.01
    gamma = jnp.ones((out_dim,), dtype=jnp.float32)   # BN affine weight
    beta = jnp.zeros((out_dim,), dtype=jnp.float32)   # BN affine bias

    out = sent2featmap(
        x, weight, bias, gamma, beta, row=row, col=col, channel=channel
    )
    out = jax.block_until_ready(out)

    # Reference in plain JAX: full PyTorch math (Linear WITH bias, then
    # training-mode BN).  The kernel drops the bias because BN cancels it;
    # results agree to float rounding.
    y_ref = x @ weight + bias
    mean = y_ref.mean(axis=0, keepdims=True)
    var = ((y_ref - mean) ** 2).mean(axis=0, keepdims=True)
    y_ref = gamma * (y_ref - mean) / jnp.sqrt(var + _BN_EPS) + beta
    ref = y_ref.reshape(B, channel, row, col)

    assert out.shape == (B, channel, row, col)
    assert jnp.allclose(out, ref, atol=1e-4, rtol=1e-4)

    print("KERNEL_OK")
</pallas_src>

<mosaic_0001>
module attributes {stable_mosaic.version = 11 : i64} {
  func.func @_sent2featmap_kernel(%arg0: i32, %arg1: i32, %arg2: memref<2x32xf32, #tpu.memory_space<vmem>>, %arg3: memref<32x512xf32, #tpu.memory_space<vmem>>, %arg4: memref<1x512xf32, #tpu.memory_space<vmem>>, %arg5: memref<1x512xf32, #tpu.memory_space<vmem>>, %arg6: memref<2x512xf32, #tpu.memory_space<vmem>>, %arg7: memref<2x512xf32, #tpu.memory_space<vmem>>) attributes {dimension_semantics = [#tpu.dimension_semantics<parallel>, #tpu.dimension_semantics<arbitrary>], iteration_bounds = array<i64: 2, 1>, scalar_prefetch = 0 : i64, scratch_operands = 1 : i64, tpu.core_type = #tpu.core_type<tc>, window_params = [{transform_indices = @transform_0, window_bounds = array<i64: 2, 32>}, {transform_indices = @transform_1, window_bounds = array<i64: 32, 512>}, {transform_indices = @transform_2, window_bounds = array<i64: 1, 512>}, {transform_indices = @transform_3, window_bounds = array<i64: 1, 512>}, {transform_indices = @transform_4, window_bounds = array<i64: 2, 512>}]} {
    %c0_i32 = arith.constant 0 : i32
    %0 = arith.cmpi eq, %arg1, %c0_i32 : i32
    %1 = arith.extui %0 : i1 to i32
    %c0_i32_0 = arith.constant 0 : i32
    %2 = arith.cmpi ne, %1, %c0_i32_0 : i32
    scf.if %2 {
      %cst_10 = arith.constant 0.000000e+00 : f32
      %12 = vector.broadcast %cst_10 : f32 to vector<2x512xf32>
      %c0_11 = arith.constant 0 : index
      %c0_12 = arith.constant 0 : index
      %13 = vector.load %arg7[%c0_11, %c0_12] : memref<2x512xf32, #tpu.memory_space<vmem>>, vector<2x512xf32>
      tpu.vector_store %arg7[%c0_11, %c0_12], %12 {strides = array<i32>} : memref<2x512xf32, #tpu.memory_space<vmem>>, vector<2x512xf32>,
    } else {
    }
    %c0 = arith.constant 0 : index
    %c0_1 = arith.constant 0 : index
    %3 = vector.load %arg7[%c0, %c0_1] : memref<2x512xf32, #tpu.memory_space<vmem>>, vector<2x512xf32>
    %c0_2 = arith.constant 0 : index
    %c0_3 = arith.constant 0 : index
    %4 = vector.load %arg2[%c0_2, %c0_3] : memref<2x32xf32, #tpu.memory_space<vmem>>, vector<2x32xf32>
    %c0_4 = arith.constant 0 : index
    %c0_5 = arith.constant 0 : index
    %5 = vector.load %arg3[%c0_4, %c0_5] : memref<32x512xf32, #tpu.memory_space<vmem>>, vector<32x512xf32>
    %cst = arith.constant dense<0.000000e+00> : vector<2x512xf32>
    %6 = tpu.matmul %4, %5, %cst {dimension_numbers = #tpu.dot_dimension_numbers<[1], [0], [0], [1], [0, 0, 1, 1], [], []>} : vector<2x32xf32>, vector<32x512xf32>, vector<2x512xf32> -> vector<2x512xf32>
    %7 = arith.addf %3, %6 : vector<2x512xf32>
    %c0_6 = arith.constant 0 : index
    %c0_7 = arith.constant 0 : index
    %8 = vector.load %arg7[%c0_6, %c0_7] : memref<2x512xf32, #tpu.memory_space<vmem>>, vector<2x512xf32>
    tpu.vector_store %arg7[%c0_6, %c0_7], %7 {strides = array<i32>} : memref<2x512xf32, #tpu.memory_space<vmem>>, vector<2x512xf32>,
    %c0_i32_8 = arith.constant 0 : i32
    %9 = arith.cmpi eq, %arg1, %c0_i32_8 : i32
    %10 = arith.extui %9 : i1 to i32
    %c0_i32_9 = arith.constant 0 : i32
    %11 = arith.cmpi ne, %10, %c0_i32_9 : i32
    scf.if %11 {
      %c0_10 = arith.constant 0 : index
      %c0_11 = arith.constant 0 : index
      %12 = vector.load %arg7[%c0_10, %c0_11] : memref<2x512xf32, #tpu.memory_space<vmem>>, vector<2x512xf32>
      %cst_12 = arith.constant dense<0.000000e+00> : vector<512xf32>
      %13 = vector.multi_reduction <add>, %12, %cst_12 [0] : vector<2x512xf32> to vector<512xf32>
      %14 = vector.shape_cast %13 : vector<512xf32> to vector<1x512xf32>
      %cst_13 = arith.constant 2.000000e+00 : f32
      %15 = vector.broadcast %cst_13 : f32 to vector<1x512xf32>
      %16 = arith.divf %14, %15 : vector<1x512xf32>
      %17 = vector.broadcast %16 : vector<1x512xf32> to vector<2x512xf32>
      %18 = arith.subf %12, %17 : vector<2x512xf32>
      %19 = arith.mulf %18, %18 : vector<2x512xf32>
      %cst_14 = arith.constant dense<0.000000e+00> : vector<512xf32>
      %20 = vector.multi_reduction <add>, %19, %cst_14 [0] : vector<2x512xf32> to vector<512xf32>
      %21 = vector.shape_cast %20 : vector<512xf32> to vector<1x512xf32>
      %cst_15 = arith.constant 2.000000e+00 : f32
      %22 = vector.broadcast %cst_15 : f32 to vector<1x512xf32>
      %23 = arith.divf %21, %22 : vector<1x512xf32>
      %cst_16 = arith.constant 9.99999974E-6 : f32
      %24 = vector.broadcast %cst_16 : f32 to vector<1x512xf32>
      %25 = arith.addf %23, %24 : vector<1x512xf32>
      %26 = math.rsqrt %25 : vector<1x512xf32>
      %c0_17 = arith.constant 0 : index
      %c0_18 = arith.constant 0 : index
      %27 = vector.load %arg4[%c0_17, %c0_18] : memref<1x512xf32, #tpu.memory_space<vmem>>, vector<1x512xf32>
      %28 = arith.mulf %27, %26 : vector<1x512xf32>
      %c0_19 = arith.constant 0 : index
      %c0_20 = arith.constant 0 : index
      %29 = vector.load %arg5[%c0_19, %c0_20] : memref<1x512xf32, #tpu.memory_space<vmem>>, vector<1x512xf32>
      %30 = arith.mulf %16, %28 : vector<1x512xf32>
      %31 = arith.subf %29, %30 : vector<1x512xf32>
      %32 = vector.broadcast %28 : vector<1x512xf32> to vector<2x512xf32>
      %33 = arith.mulf %12, %32 : vector<2x512xf32>
      %34 = vector.broadcast %31 : vector<1x512xf32> to vector<2x512xf32>
      %35 = arith.addf %33, %34 : vector<2x512xf32>
      %c0_21 = arith.constant 0 : index
      %c0_22 = arith.constant 0 : index
      %36 = vector.load %arg6[%c0_21, %c0_22] : memref<2x512xf32, #tpu.memory_space<vmem>>, vector<2x512xf32>
      tpu.vector_store %arg6[%c0_21, %c0_22], %35 {strides = array<i32>} : memref<2x512xf32, #tpu.memory_space<vmem>>, vector<2x512xf32>,
    } else {
    }
    return
  }
  func.func @transform_0(%arg0: i32, %arg1: i32) -> (i32, i32) {
    %c0_i32 = arith.constant 0 : i32
    %c0_i32_0 = arith.constant 0 : i32
    return %c0_i32, %arg1 : i32, i32
  }
  func.func @transform_1(%arg0: i32, %arg1: i32) -> (i32, i32) {
    %c0_i32 = arith.constant 0 : i32
    return %arg1, %arg0 : i32, i32
  }
  func.func @transform_2(%arg0: i32, %arg1: i32) -> (i32, i32) {
    %c0_i32 = arith.constant 0 : i32
    %c0_i32_0 = arith.constant 0 : i32
    return %c0_i32, %arg0 : i32, i32
  }
  func.func @transform_3(%arg0: i32, %arg1: i32) -> (i32, i32) {
    %c0_i32 = arith.constant 0 : i32
    %c0_i32_0 = arith.constant 0 : i32
    return %c0_i32, %arg0 : i32, i32
  }
  func.func @transform_4(%arg0: i32, %arg1: i32) -> (i32, i32) {
    %c0_i32 = arith.constant 0 : i32
    %c0_i32_0 = arith.constant 0 : i32
    return %c0_i32, %arg0 : i32, i32
  }
}

</mosaic_0001>

<bundles_post_ra>
// kernel: tpu_custom_call.1
= control target key start
LH: loop header
LB: loop body
LE: loop exit
PB: predicated region body
PF: predicated region fallthrough
CT: control target
= control target key end

     0   :  { %s1603_s0 = inlined_call_operand.hbm [shape: f32[2,32], index: 0, kind: input, shape index: {}]   ;;  %s1604_s1 = inlined_call_operand.hbm [shape: f32[32,1024], index: 1, kind: input, shape index: {}]   ;;  %s1605_s2 = inlined_call_operand.hbm [shape: f32[1,1024], index: 2, kind: input, shape index: {}]   ;;  %s1606_s3 = inlined_call_operand.vmem [shape: f32[1,1024], index: 3, kind: input, shape index: {}]   ;;  %s1607_s4 = inlined_call_operand.hbm [shape: f32[2,1024], index: 4, kind: output, shape index: {}]  }
   0x1   :  { %1613 = sst [smem:[#allocation13_spill]] %s1604_s1 }
   0x2   :  { %1614 = sst [smem:[#allocation14_spill]] %s1605_s2 }
   0x3   :  { %9 = vsyncpa [#allocation4], 0 }
   0x4   :  { %10 = vsyncpa [#allocation7], 0 }
   0x5   :  { %12 = vsyncpa [#allocation7 + $0x1], 0 }
   0x6   :  { %13 = vsyncpa [#allocation5], 0 }
   0x7   :  { %15 = vsyncpa [#allocation5 + $0x1], 0  ;;  %s1279_s15 = smov 0   ;;  %s1281_s16 = smov 0  }
   0x8   :  { %s1283_s17 = smov 0   ;;  %s1285_s18 = smov 0  }
   0x9   :  { %s1287_s19 = smov 0   ;;  %s1289_s20 = smov 0  }
   0xa LB: > { %s33_s21 = sadd.s32 1, %s1238_s19  ;;  %s68_s22 = sadd.s32 1, %s1230_s17  ;;  %s1242_s20 = sphi %s1289_s20, %s21_s20   ;;  %s1238_s19 = sphi %s1287_s19, %s1635_s19   ;;  %s1234_s18 = sphi %s1285_s18, %s1634_s18   ;;  %s1230_s17 = sphi %s1283_s17, %s1633_s17   ;;  %s1226_s16 = sphi %s1281_s16, %s1632_s16   ;;  %s1222_s15 = sphi %s1279_s15, %s1631_s15  }
   0xb   : > { %p35_p0 = scmp.ge.s32.totalorder %s33_s21, 2  ;;  %p75_p1 = scmp.ne.s32.totalorder %s1230_s17, %s1226_s16 }
   0xc   : > { %p76_p2 = scmp.eq.s32.totalorder %s1242_s20, 0  ;;  %p1002_p5 = scmp.lt.s32.totalorder %s1242_s20, 2 }
   0xd   : > { %s1637_s21 = smov (%p35_p0, %s33_s21), 0  ;;  %s196_s24 = sand.u32 1, %s1242_s20  }
   0xe   : > { %p77_p4 = por %p76_p2, %p75_p1  ;;  %s64_s23 = ssub.s32 %s1238_s19, %s1637_s21 }
   0xf   : > { %p66_p6 = scmp.eq.s32.totalorder %s64_s23, 0  ;;  %s198_s25 = sand.u32 1, %s1230_s17  }
  0x10   : > { %s956_s26 = sshll.u32 %s1238_s19, 9  ;;  %s937_s28 = sshll.u32 %s198_s25, 7 }
  0x11   : > { %s1327_s27 = scalar_select %p66_p6, %s1230_s17, %s68_s22  }
  0x12   : > { %s1615_s1 = sld [smem:[#allocation13_spill]]  ;;  %p1336_p7 = pnand %p1002_p5, %p77_p4 }
  0x13   : > { %s200_s7 = scalar_lea.vmem [#allocation6], %s937_s28  ;;  %s1342_s9 = scalar_lea.sflag [#allocation7], %s196_s24 }
  0x14   : > { %s210_s8 = sshll.u32 %s200_s7, 4  ;;  %p1070_p9 = pneg %p1336_p7  ;;  %s1340_s8 = int_to_ptr.vmem [resolvable:$true] %s210_s8 }
  0x18   : > { %s1334_s5 = scalar_lea.hbm %s1615_s1, %s956_s26  ;;  %s1073_s13 = scalar_lea.hbm %s1615_s1, 4096 }
  0x19   : > { %s1068_s10 = scalar_lea.hbm %s1334_s5, 2048  ;;  %p1074_p12 = scmp.lt.u32.totalorder %s1334_s5, %s1615_s1 }
  0x1a   : > { %p1069_p8 = scmp.ne.s32.totalorder %s1334_s5, %s1068_s10  ;;  %p1075_p13 = scmp.lt.u32.totalorder %s1073_s13, %s1068_s10 }
  0x1b   : > { %p1077_p2 = scmp.lt.u32.totalorder %s1068_s10, %s1334_s5 }
  0x1c   : > { %p1071_p10 = pnand %p1070_p9, %p1069_p8  ;;  %p1076_p0 = por %p1075_p13, %p1074_p12 }
  0x1e   : > { %p1072_p11 = pneg %p1071_p10  ;;  %p1078_p4 = por %p1077_p2, %p1076_p0 }
  0x20   : > { %p1079_p5 = pnand %p1078_p4, %p1072_p11 }
  0x22   : > { %1082 = shalt.err (!%p1079_p5)
}
  0x23   : > { %s1083_s23 = scalar_lea.vmem %s1340_s8, 2048  ;;  %s1244_s24 = smov [#allocation6]  }
  0x24   : > { %p1084_p6 = scmp.ne.s32.totalorder %s1340_s8, %s1083_s23  ;;  %s1088_s26 = sshll.u32 %s1244_s24, 4  ;;  %s1089_s26 = int_to_ptr.vmem [resolvable:$false] %s1088_s26 }
  0x25   : > { %s1090_s28 = scalar_lea.vmem %s1089_s26, 4096  ;;  %p1091_p3 = scmp.lt.s32.totalorder %s1340_s8, %s1089_s26 }
  0x26   : > { %p1086_p8 = pnand %p1084_p6, %p1070_p9  ;;  %p1092_p12 = scmp.lt.s32.totalorder %s1090_s28, %s1083_s23 }
  0x28   : > { %p1087_p10 = pneg %p1086_p8  ;;  %p1093_p13 = por %p1092_p12, %p1091_p3 }
  0x2a   : > { %p1094_p0 = pnand %p1093_p13, %p1087_p10 }
  0x2c   : > { %1097 = shalt.err (!%p1094_p0)
}
  0x2d   : > { %s1245_s29 = smov 1024   ;;  %s1246_s30 = smov 512  }
  0x2e   : > { %s1247_s7 = smov 32   ;;  %s1371_s10 = sadd.s32 4294967295, %s1242_s20  }
  0x2f   : > { %993 = dma.hbm_to_vmem [thread:$0]  (!%p1336_p7), %s1334_s5, 2048, %s1340_s8, %s1342_s9, %s1245_s29, %s1246_s30, %s1247_s7  }
  0x30   : > { %s933_s11 = sadd.s32 4294967294, %s1242_s20   ;;  %p81_p3 = scmp.ne.s32.totalorder %s1226_s16, %s1222_s15 }
  0x31   : > { %p1608_p11 = scmp.eq.s32.totalorder %s1371_s10, 0  ;;  %p157_p2 = scmp.eq.s32.totalorder %s1371_s10, 1 }
  0x32   : > { %p163_p4 = scmp.eq.s32.totalorder %s933_s11, 1  ;;  %p934_p6 = scmp.ge.s32.totalorder %s1242_s20, 1 }
  0x33   : > { %p1380_p5 = por %p1608_p11, %p81_p3  ;;  %p1388_p8 = por %p157_p2, %p75_p1 }
  0x34   : > { %p1392_p10 = por %p163_p4, %p81_p3  ;;  %p170_p12 = scmp.lt.s32.totalorder %s1242_s20, 3 }
  0x35   : > { %s1617_s12 = scalar_select %p1380_p5, 1, 0 }
  0x36   : > { %s1618_s5 = scalar_select %p1388_p8, 1, 0 }
  0x37   : > { %s1619_s8 = scalar_select %p1392_p10, 1, 0 }
  0x38   : > { %s940_s13 = sshll.u32 %s198_s25, 2  ;;  %p1399_p13 = pnand %p934_p6, %p170_p12 }
  0x39   : > { %s1248_s22 = smov [#allocation3]   ;;  %s957_s24 = sshll.u32 %s1238_s19, 6 }
  0x3a   : > { %s1620_s14 = scalar_select %p1399_p13, 1, 0 }
  0x3b   : > { %s185_s23 = sshll.u32 %s1248_s22, 4  ;;  %p986_p1 = pneg %p1399_p13  ;;  %s1403_s23 = int_to_ptr.vmem [resolvable:$true] %s185_s23 }
  0x3c   : > { %s1621_s2 = sld [smem:[#allocation14_spill]]  ;;  %s224_s25 = scalar_lea.vmem [#allocation8], %s940_s13 }
  0x3d   : > { %s232_s30 = sshll.u32 %s224_s25, 4  ;;  %p1415_p0 = pnand %p986_p1, %p1608_p11  ;;  %s233_s30 = int_to_ptr.vmem [resolvable:$true] %s232_s30 }
  0x3f   : > { %s1622_s7 = scalar_select %p1415_p0, 1, 0 }
  0x42   : > { %s1411_s29 = scalar_lea.hbm %s1621_s2, %s957_s24  ;;  %s1103_s26 = scalar_lea.hbm %s1621_s2, 128 }
  0x43   : > { %s1098_s11 = scalar_lea.hbm %s1411_s29, 64  ;;  %p1104_p6 = scmp.lt.u32.totalorder %s1411_s29, %s1621_s2 }
  0x44   : > { %p1099_p3 = scmp.ne.s32.totalorder %s1411_s29, %s1098_s11  ;;  %p1105_p12 = scmp.lt.u32.totalorder %s1103_s26, %s1098_s11 }
  0x45   : > { %p1107_p11 = scmp.lt.u32.totalorder %s1098_s11, %s1411_s29 }
  0x46   : > { %p1101_p2 = pnand %p1099_p3, %p1070_p9  ;;  %p1106_p1 = por %p1105_p12, %p1104_p6 }
  0x48   : > { %p1102_p4 = pneg %p1101_p2  ;;  %p1108_p10 = por %p1107_p11, %p1106_p1 }
  0x4a   : > { %p1109_p8 = pnand %p1108_p10, %p1102_p4 }
  0x4c   : > { %1112 = shalt.err (!%p1109_p8)
}
  0x4d   : > { %s1113_s13 = scalar_lea.vmem %s233_s30, 64  ;;  %s1249_s25 = smov [#allocation8]  }
  0x4e   : > { %p1114_p5 = scmp.ne.s32.totalorder %s233_s30, %s1113_s13  ;;  %s1118_s22 = sshll.u32 %s1249_s25, 4  ;;  %s1119_s22 = int_to_ptr.vmem [resolvable:$false] %s1118_s22 }
  0x4f   : > { %s1120_s24 = scalar_lea.vmem %s1119_s22, 128  ;;  %p1121_p13 = scmp.lt.s32.totalorder %s233_s30, %s1119_s22 }
  0x50   : > { %p1116_p3 = pnand %p1114_p5, %p1070_p9  ;;  %p1122_p0 = scmp.lt.s32.totalorder %s1120_s24, %s1113_s13 }
  0x52   : > { %p1117_p2 = pneg %p1116_p3  ;;  %p1123_p6 = por %p1122_p0, %p1121_p13 }
  0x54   : > { %p1124_p12 = pnand %p1123_p6, %p1117_p2 }
  0x56   : > { %1127 = shalt.err (!%p1124_p12)
}
  0x57   : > { %996 = dma.hbm_to_vmem [thread:$0]  (!%p1336_p7), %s1411_s29, 64, %s233_s30, %s1342_s9  }
  0x58   : > { %s1128_s26 = scalar_lea.hbm %s1603_s0, 32  ;;  %p1623_p11 = scmp.ne.s32.totalorder %s1622_s7, 0 }
  0x59   : > { %p1129_p9 = scmp.ne.s32.totalorder %s1603_s0, %s1128_s26  ;;  %p1135_p13 = scmp.lt.u32.totalorder %s1128_s26, %s1603_s0 }
  0x5a   : > { %p1130_p5 = pneg %p1623_p11 }
  0x5c   : > { %p1131_p8 = pnand %p1130_p5, %p1129_p9 }
  0x5e   : > { %p1132_p10 = pneg %p1131_p8 }
  0x60   : > { %p1137_p0 = pnand %p1135_p13, %p1132_p10 }
  0x62   : > { %1140 = shalt.err (!%p1137_p0)
}
  0x63   : > { %s1141_s6 = scalar_lea.vmem %s1403_s23, 32  ;;  %p1149_p3 = scmp.lt.s32.totalorder %s1403_s23, %s1403_s23 }
  0x64   : > { %p1142_p7 = scmp.ne.s32.totalorder %s1403_s23, %s1141_s6  ;;  %p1150_p2 = scmp.lt.s32.totalorder %s1141_s6, %s1141_s6 }
  0x66   : > { %p1144_p4 = pnand %p1142_p7, %p1130_p5  ;;  %p1151_p6 = por %p1150_p2, %p1149_p3 }
  0x68   : > { %p1145_p1 = pneg %p1144_p4 }
  0x6a   : > { %p1152_p12 = pnand %p1151_p6, %p1145_p1 }
  0x6c   : > { %1155 = shalt.err (!%p1152_p12)
}
  0x6d   : > { %989 = dma.hbm_to_vmem [thread:$0]  (!%p1623_p11), %s1603_s0, 32, %s1403_s23, [#allocation4]  }
  0x6e   : > { %p1624_p9 = scmp.ne.s32.totalorder %s1620_s14, 0 }
  0x6f   : > { %p1625_p8 = scmp.eq.s32.totalorder (!%p1624_p9), %s1371_s10, 0 }
  0x70   : > { %249 = sbr.rel (%p1624_p9) target bundleno = 468 (0x1d4), region = 36 }
  0x77   : > { %1209 = dma.done.wait (%p1625_p8), [#allocation4], 32   ;;  %p1626_p5 = pmov %p1625_p8 }
  0x78   : > { %s255_s29 = sand.u32 1, %s1371_s10   ;;  %s1468_s30 = sand.u32 1, %s1226_s16  }
  0x79   : > { %1211 = vsyncadd (%p1626_p5), [#allocation4], 4294967264  ;;  %s945_s7 = sshll.u32 %s1468_s30, 7  ;;  %s256_s22 = scalar_lea.sflag [#allocation7], %s255_s29 }
  0x7a   : > { %s1471_s24 = scalar_lea.vmem [#allocation6], %s945_s7  ;;  %p1627_p11 = scmp.ne.s32.totalorder %s1617_s12, 0 }
  0x7c   : > { %1213 = dma.done.wait (%p1627_p11), %s256_s22, 2112  }
  0x7d   : > { %1215 = vsyncadd (%p1627_p11), %s256_s22, 4294965184  ;;  %v1250_v0 = vmov 0.0   ;;  %v319_v1 = vld [vmem:[%s1471_s24 + $0x8] sm:$0xff]  ;;  %v321_v3 = vld [vmem:[%s1471_s24 + $0x18] sm:$0xff]  ;;  %vm334_vm0 = vcmask 261120   ;;  %v489_v28 = vlaneseq  ;;  %vm530_vm1 = vcmask 1041408  }
  0x7e   : > { %402 = vmatprep.mubr.f32.mxu0 %v1250_v0  ;;  %473 = vmatprep.mubr.f32.mxu1 %v1250_v0  ;;  %v323_v2 = vld [vmem:[%s1471_s24 + $0x28] sm:$0xff]  ;;  %v325_v5 = vld [vmem:[%s1471_s24 + $0x38] sm:$0xff]  ;;  %v318_v6 = vld [vmem:[%s1471_s24] sm:$0xff]  ;;  %v1251_v26 = vmov 1983009808   ;;  %s946_s10 = sshll.u32 %s1468_s30, 2 }
  0x7f   : > { %v960_v4 = vpack.c.bf16 %v323_v2, %v319_v1  ;;  %v322_v7 = vld [vmem:[%s1471_s24 + $0x20] sm:$0xff]  ;;  %v968_v8 = vpack.c.bf16 %v325_v5, %v321_v3  ;;  %v320_v10 = vld [vmem:[%s1471_s24 + $0x10] sm:$0xff]  ;;  %v327_v12 = vld [vmem:[%s1471_s24 + $0x48] sm:$0xff]  ;;  %v487_v27 = vunpack.c.l.s4 %v1251_v26  ;;  %v1493_v30 = vshrl.u32 %v489_v28, 7  ;;  %s948_s12 = sshll.u32 %s1234_s18, 2  ;;  %s268_s14 = scalar_lea.vmem [#allocation8], %s946_s10 }
  0x80   : > { %v962_v9 = vpack.c.bf16 %v322_v7, %v318_v6  ;;  %v324_v11 = vld [vmem:[%s1471_s24 + $0x30] sm:$0xff]  ;;  %v331_v14 = vld [vmem:[%s1471_s24 + $0x68] sm:$0xff]  ;;  %v329_v15 = vld [vmem:[%s1471_s24 + $0x58] sm:$0xff]  ;;  %p306_p10 = scmp.lt.s32.totalorder %s948_s12, 7  ;;  %s947_s26 = sshll.u32 %s1468_s30, 3 }
  0x81   : > { %961 = vmatprep.subr.bf16.mxu0 %v960_v4  ;;  %v970_v13 = vpack.c.bf16 %v324_v11, %v320_v10  ;;  %v333_v16 = vld [vmem:[%s1471_s24 + $0x78] sm:$0xff]  ;;  %969 = vmatprep.subr.bf16.mxu1 %v968_v8  ;;  %v964_v17 = vpack.c.bf16 %v331_v14, %v327_v12  ;;  %v326_v19 = vld [vmem:[%s1471_s24 + $0x40] sm:$0xff]  ;;  %v328_v21 = vld [vmem:[%s1471_s24 + $0x50] sm:$0xff]  ;;  %v488_v29 = vunpack.c.0.s8 %v487_v27  ;;  %s958_s28 = sshll.u32 %s1234_s18, 7  ;;  %s301_s13 = scalar_lea.vmem [#allocation9], %s947_s26 }
  0x82   : > { %963 = vmatpush1.bf16.msra.mxu0 %v962_v9  ;;  %v972_v18 = vpack.c.bf16 %v333_v16, %v329_v15  ;;  %v330_v20 = vld [vmem:[%s1471_s24 + $0x60] sm:$0xff]  ;;  %v332_v23 = vld [vmem:[%s1471_s24 + $0x70] sm:$0xff]  ;;  %v317_v25 = vld [vmem:[#allocation3] sm:$0x3]  ;;  %s1639_s12 = smov (!%p306_p10, %s948_s12), 7  ;;  %s808_s25 = sshll.u32 %s301_s13, 4  ;;  %s1556_s25 = int_to_ptr.vmem [resolvable:$true] %s808_s25 }
  0x83   : > { %971 = vmatpush1.bf16.msra.mxu1 %v970_v13  ;;  %v966_v22 = vpack.c.bf16 %v330_v20, %v326_v19  ;;  %965 = vmatprep.subr.bf16.mxu0 %v964_v17  ;;  %v974_v24 = vpack.c.bf16 %v332_v23, %v328_v21  ;;  %v1496_v32 = vsub.s32 %v488_v29, %v1493_v30  ;;  %s308_s11 = scalar_lea.vmem %s1606_s3, %s1639_s12  ;;  %s1554_s9 = scalar_lea.hbm %s1607_s4, %s958_s28 }
  0x84   : > { %973 = vmatprep.subr.bf16.mxu1 %v972_v18  ;;  %s794_s29 = scalar_lea.sflag [#allocation5], %s1468_s30  ;;  %s1156_s7 = scalar_lea.vmem %s1556_s25, 128 }
  0x85   : > { %p1157_p13 = scmp.ne.s32.totalorder %s1556_s25, %s1156_s7  ;;  %p1628_p0 = scmp.ne.s32.totalorder %s1618_s5, 0 }
  0x86   : > { %967 = vmatpush1.bf16.msra.mxu0 %v966_v22  ;;  %s1253_s18 = smov [#allocation9]  }
  0x87   : > { %975 = vmatpush1.bf16.msra.mxu1 %v974_v24  ;;  %p1158_p7 = pnand %p1157_p13, %p1628_p0  ;;  %s1160_s22 = sshll.u32 %s1253_s18, 4  ;;  %s1161_s22 = int_to_ptr.vmem [resolvable:$false] %s1160_s22 }
  0x88   : > { %s1162_s24 = scalar_lea.vmem %s1161_s22, 256  ;;  %p1163_p1 = scmp.lt.s32.totalorder %s1556_s25, %s1161_s22 }
  0x89   : > { %949 = vmatmul.mubr.msk.f32.vlgmr.msra.gmra.mrb[0].mxu0 %vm334_vm0, %v317_v25  ;;  %p1159_p4 = pneg %p1158_p7  ;;  %p1164_p3 = scmp.lt.s32.totalorder %s1162_s24, %s1156_s7 }
  0x8a   : > { %950 = vmatmul.mubr.msk.f32.vlgmr.msra.gmra.mrb[0].mxu1 %vm334_vm0, %v317_v25 }
  0x8b   : > { %p1165_p2 = por %p1164_p3, %p1163_p1 }
  0x8d   : > { %p1166_p6 = pnand %p1165_p2, %p1159_p4 }
 0x15c   : > { %v404_v31 = vpop.f32.mrb[0].mxu0 }
 0x15d   : > { %v475_v33 = vpop.f32.mrb[0].mxu1  ;;  %v406_v34 = vpop.f32.mrb[1].mxu0 }
 0x15e   : > { %v484_v35 = vcombine.low %v404_v31, %v406_v34  ;;  %v477_v36 = vpop.f32.mrb[1].mxu1 }
 0x15f   : > { %v485_v37 = vcombine.low %v475_v33, %v477_v36 }
 0x160   : > { %v492_v38 = vrot.slane %v484_v35, %v1496_v32 }
 0x161   : > { %v499_v39 = vrot.slane %v485_v37, %v1496_v32 }
 0x163   : > { %v1500_v40 = vcombine.low %v492_v38, %v499_v39  ;;  %v959_v41 = vcombine.low %v499_v39, %v499_v39 }
 0x165   : > { %v516_v42 = vrot.slane %v1500_v40, %v1496_v32  ;;  %v523_v43 = vrot.slane %v959_v41, %v1496_v32 }
 0x167   : > { %v524_v44 = vcombine.high %v516_v42, %v516_v42  ;;  %v525_v45 = vcombine.high %v523_v43, %v523_v43  ;;  %v531_v46 = vsel %vm530_vm1, %v516_v42, 0.0  ;;  %v545_v47 = vsel %vm530_vm1, %v523_v43, 0.0 }
 0x168   : > { %v532_v48 = vrot.slane %v531_v46, 4  ;;  %v546_v49 = vrot.slane %v545_v47, 4 }
 0x169   : > { %v538_v50 = vsel %vm530_vm1, %v524_v44, 0.0  ;;  %v552_v51 = vsel %vm530_vm1, %v525_v45, 0.0 }
 0x16a   : > { %v533_v52 = vadd.f32 %v532_v48, %v531_v46  ;;  %v539_v53 = vrot.slane %v538_v50, 4  ;;  %v547_v54 = vadd.f32 %v546_v49, %v545_v47  ;;  %v553_v55 = vrot.slane %v552_v51, 4 }
 0x16c   : > { %v534_v56 = vrot.slane %v533_v52, 2  ;;  %v540_v57 = vadd.f32 %v539_v53, %v538_v50  ;;  %v548_v58 = vrot.slane %v547_v54, 2  ;;  %v554_v59 = vadd.f32 %v553_v55, %v552_v51 }
 0x16e   : > { %v535_v60 = vadd.f32 %v534_v56, %v533_v52  ;;  %v541_v61 = vrot.slane %v540_v57, 2  ;;  %v549_v62 = vadd.f32 %v548_v58, %v547_v54  ;;  %v555_v63 = vrot.slane %v554_v59, 2 }
 0x170   : > { %v536_v0 = vrot.slane %v535_v60, 1  ;;  %v542_v1 = vadd.f32 %v541_v61, %v540_v57  ;;  %v550_v2 = vrot.slane %v549_v62, 1  ;;  %v556_v3 = vadd.f32 %v555_v63, %v554_v59 }
 0x172   : > { %v537_v4 = vadd.f32 %v536_v0, %v535_v60  ;;  %v543_v5 = vrot.slane %v542_v1, 1  ;;  %v551_v6 = vadd.f32 %v550_v2, %v549_v62  ;;  %v557_v7 = vrot.slane %v556_v3, 1 }
 0x174   : > { %v544_v8 = vadd.f32 %v543_v5, %v542_v1  ;;  %v558_v9 = vadd.f32 %v557_v7, %v556_v3  ;;  %v1509_v10 = vmul.f32 0.5, %v537_v4  ;;  %v1513_v12 = vmul.f32 0.5, %v551_v6 }
 0x175   : > { %v1252_v1 = vmov 1966171168  }
 0x176   : > { %v1511_v11 = vmul.f32 0.5, %v544_v8  ;;  %v1515_v13 = vmul.f32 0.5, %v558_v9  ;;  %v658_v2 = vunpack.c.l.s4 %v1252_v1 }
 0x178   : > { %v568_v14 = vcombine.low %v1509_v10, %v1511_v11  ;;  %v569_v15 = vcombine.low %v1513_v12, %v1515_v13  ;;  %v659_v3 = vunpack.c.0.s8 %v658_v2 }
 0x17a   : > { %v576_v16 = vrot.slane %v568_v14, %v1496_v32  ;;  %v583_v17 = vrot.slane %v569_v15, %v1496_v32  ;;  %v662_v8 = vsub.s32 %v659_v3, %v1493_v30 }
 0x17c   : > { %v584_v18 = vcombine.low %v576_v16, %v583_v17 }
 0x17e   : > { %v586_v19 = vsub.f32 %v1500_v40, %v584_v18  ;;  %v650_v18 = vld [vmem:[%s268_s14] sm:$0xf] }
 0x180   : > { %v587_v20 = vmul.f32 %v586_v19, %v586_v19  ;;  %v685_v19 = vsub.s32 0, %v1493_v30 }
 0x182   : > { %v589_v21 = vcombine.high %v587_v20, %v587_v20  ;;  %v596_v22 = vrot.slane %v587_v20, %v1496_v32 }
 0x184   : > { %v603_v23 = vrot.slane %v589_v21, %v1496_v32  ;;  %v604_v24 = vcombine.high %v596_v22, %v596_v22  ;;  %v610_v25 = vsel %vm530_vm1, %v596_v22, 0.0  ;;  %v689_v21 = vsub.s32 1, %v1493_v30 }
 0x185   : > { %v611_v26 = vrot.slane %v610_v25, 4  ;;  %v693_v22 = vsub.s32 2, %v1493_v30 }
 0x186   : > { %v605_v27 = vcombine.high %v603_v23, %v603_v23  ;;  %v617_v28 = vsel %vm530_vm1, %v604_v24, 0.0  ;;  %v624_v29 = vsel %vm530_vm1, %v603_v23, 0.0  ;;  %v697_v23 = vsub.s32 3, %v1493_v30 }
 0x187   : > { %v612_v31 = vadd.f32 %v611_v26, %v610_v25  ;;  %v618_v33 = vrot.slane %v617_v28, 4  ;;  %v625_v34 = vrot.slane %v624_v29, 4 }
 0x188   : > { %v631_v35 = vsel %vm530_vm1, %v605_v27, 0.0 }
 0x189   : > { %v613_v36 = vrot.slane %v612_v31, 2  ;;  %v619_v37 = vadd.f32 %v618_v33, %v617_v28  ;;  %v626_v38 = vadd.f32 %v625_v34, %v624_v29  ;;  %v632_v39 = vrot.slane %v631_v35, 4 }
 0x18b   : > { %v614_v41 = vadd.f32 %v613_v36, %v612_v31  ;;  %v620_v42 = vrot.slane %v619_v37, 2  ;;  %v627_v43 = vrot.slane %v626_v38, 2  ;;  %v633_v44 = vadd.f32 %v632_v39, %v631_v35 }
 0x18d   : > { %v615_v45 = vrot.slane %v614_v41, 1  ;;  %v621_v46 = vadd.f32 %v620_v42, %v619_v37  ;;  %v628_v47 = vadd.f32 %v627_v43, %v626_v38  ;;  %v634_v48 = vrot.slane %v633_v44, 2 }
 0x18f   : > { %v616_v49 = vadd.f32 %v615_v45, %v614_v41  ;;  %v622_v50 = vrot.slane %v621_v46, 1  ;;  %v629_v51 = vrot.slane %v628_v47, 1  ;;  %v635_v52 = vadd.f32 %v634_v48, %v633_v44 }
 0x191   : > { %v623_v53 = vadd.f32 %v622_v50, %v621_v46  ;;  %v630_v54 = vadd.f32 %v629_v51, %v628_v47  ;;  %v636_v55 = vrot.slane %v635_v52, 1  ;;  %v638_v56 = vmul.f32 0.5, %v616_v49 }
 0x193   : > { %v637_v57 = vadd.f32 %v636_v55, %v635_v52  ;;  %v639_v58 = vmul.f32 0.5, %v623_v53  ;;  %v640_v59 = vmul.f32 0.5, %v630_v54  ;;  %v642_v60 = vadd.f32 1e-05, %v638_v56 }
 0x195   : > { %v641_v61 = vmul.f32 0.5, %v637_v57  ;;  %v643_v62 = vadd.f32 1e-05, %v639_v58  ;;  %v644_v63 = vadd.f32 1e-05, %v640_v59  ;;  %1060 = vrsqrt.f32 %v642_v60 }
 0x197   : > { %v645_v0 = vadd.f32 1e-05, %v641_v61  ;;  %1062 = vrsqrt.f32 %v643_v62 }
 0x198   : > { %1064 = vrsqrt.f32 %v644_v63 }
 0x199   : > { %1066 = vrsqrt.f32 %v645_v0 }
 0x19f   : > { %v1061_v4 = vpop.eup %1060 }
 0x1a1   : > { %v1063_v5 = vpop.eup %1062 }
 0x1a2   : > { %v1065_v6 = vpop.eup %1064  ;;  %v655_v7 = vcombine.low %v1061_v4, %v1063_v5 }
 0x1a3   : > { %v1067_v9 = vpop.eup %1066 }
 0x1a4   : > { %v656_v14 = vcombine.low %v1065_v6, %v1067_v9  ;;  %v663_v15 = vrot.slane %v655_v7, %v662_v8 }
 0x1a6   : > { %v670_v16 = vrot.slane %v656_v14, %v662_v8 }
 0x1a8   : > { %v671_v17 = vcombine.low %v663_v15, %v670_v16 }
 0x1aa   : > { %v678_v20 = vrot.slane %v671_v17, %v662_v8 }
 0x1ac   : > { %v680_v24 = vmul.f32 %v678_v20, %v650_v18 }
 0x1ae   : > { %v686_v25 = vrot.slane %v680_v24, %v685_v19  ;;  %v690_v26 = vrot.slane %v680_v24, %v689_v21  ;;  %v694_v27 = vrot.slane %v680_v24, %v693_v22  ;;  %v698_v28 = vrot.slane %v680_v24, %v697_v23 }
 0x1b0   : > { %v703_v29 = vmul.f32 %v686_v25, %v1509_v10  ;;  %v704_v31 = vmul.f32 %v690_v26, %v1511_v11  ;;  %v705_v33 = vmul.f32 %v694_v27, %v1513_v12  ;;  %v706_v34 = vmul.f32 %v698_v28, %v1515_v13  ;;  %v681_v10 = vld [vmem:[%s308_s11] sm:$0xf] }
 0x1b1   : > { %v737_v39 = vcombine.low %v686_v25, %v690_v26  ;;  %v738_v41 = vcombine.low %v694_v27, %v698_v28 }
 0x1b2   : > { %v711_v35 = vcombine.low %v703_v29, %v704_v31  ;;  %v712_v36 = vcombine.low %v705_v33, %v706_v34 }
 0x1b3   : > { %v745_v43 = vrot.slane %v737_v39, %v1496_v32  ;;  %v752_v12 = vrot.slane %v738_v41, %v1496_v32 }
 0x1b4   : > { %v719_v30 = vrot.slane %v711_v35, %v662_v8  ;;  %v726_v37 = vrot.slane %v712_v36, %v662_v8 }
 0x1b5   : > { %v753_v47 = vcombine.low %v745_v43, %v752_v12 }
 0x1b6   : > { %v727_v38 = vcombine.low %v719_v30, %v726_v37 }
 0x1b7   : > { %v755_v52 = vmul.f32 %v753_v47, %v1500_v40 }
 0x1b8   : > { %v734_v42 = vrot.slane %v727_v38, %v662_v8 }
 0x1ba   : > { %v736_v11 = vsub.f32 %v681_v10, %v734_v42 }
 0x1bc   : > { %v760_v13 = vrot.slane %v736_v11, %v685_v19  ;;  %v764_v44 = vrot.slane %v736_v11, %v689_v21  ;;  %v768_v45 = vrot.slane %v736_v11, %v693_v22  ;;  %v772_v46 = vrot.slane %v736_v11, %v697_v23 }
 0x1be   : > { %v773_v48 = vcombine.low %v760_v13, %v764_v44  ;;  %v774_v49 = vcombine.low %v768_v45, %v772_v46 }
 0x1c0   : > { %v781_v50 = vrot.slane %v773_v48, %v1496_v32  ;;  %v788_v51 = vrot.slane %v774_v49, %v1496_v32 }
 0x1c2   : > { %v789_v53 = vcombine.low %v781_v50, %v788_v51 }
 0x1c4   : > { %v791_v54 = vadd.f32 %v789_v53, %v755_v52 }
 0x1c6   : > { %792 = vst [vmem:[%s301_s13] sm:$0xff] %v791_v54 }
 0x1c7   : > { %1169 = shalt.err (!%p1166_p6)
}
 0x1c8   : > { %s1170_s30 = scalar_lea.hbm %s1554_s9, 128  ;;  %s1174_s14 = scalar_lea.hbm %s1607_s4, 256 }
 0x1c9   : > { %p1171_p12 = scmp.ne.s32.totalorder %s1554_s9, %s1170_s30  ;;  %p1175_p5 = scmp.lt.u32.totalorder %s1554_s9, %s1607_s4 }
 0x1ca   : > { %p1176_p11 = scmp.lt.u32.totalorder %s1174_s14, %s1170_s30  ;;  %p1178_p13 = scmp.lt.u32.totalorder %s1170_s30, %s1554_s9 }
 0x1cb   : > { %p1172_p9 = pnand %p1171_p12, %p1628_p0 }
 0x1cc   : > { %p1177_p10 = por %p1176_p11, %p1175_p5 }
 0x1cd   : > { %p1173_p8 = pneg %p1172_p9 }
 0x1ce   : > { %p1179_p7 = por %p1178_p13, %p1177_p10 }
 0x1d0   : > { %p1180_p4 = pnand %p1179_p7, %p1173_p8 }
 0x1d2   : > { %1183 = shalt.err (!%p1180_p4)
}
 0x1d3   : > { %984 = dma.vmem_to_hbm [thread:$0]  (%p1628_p0), %s1556_s25, 128, %s1554_s9, %s794_s29  }
 0x1d4 PF: > { %s820_s11 = sand.u32 1, %s1222_s15   ;;  %p1629_p1 = scmp.ne.s32.totalorder %s1619_s8, 0 }
 0x1d5   : > { %p1630_p3 = scmp.ge.s32.totalorder %s1242_s20, 2  ;;  %s821_s26 = scalar_lea.sflag [#allocation5], %s820_s11 }
 0x1d7   : > { %p998_p2 = pnand %p1630_p3, %p1629_p1 }
 0x1d9   : > { %1217 = dma.done.wait (!%p998_p2), %s821_s26, 128  }
 0x1da   : > { %1219 = vsyncadd (!%p998_p2), %s821_s26, 4294967168  ;;  %s21_s20 = sadd.s32 1, %s1242_s20   ;;  %s1631_s15 = smov %s1226_s16 }
 0x1db   : > { %p18_p6 = scmp.ge.s32.totalorder %s21_s20, 4   ;;  %s1632_s16 = smov %s1230_s17 }
 0x1dc   : > { %s1633_s17 = smov %s1327_s27  ;;  %s1634_s18 = smov %s1238_s19 }
 0x1dd   : > { %s1635_s19 = smov %s1637_s21  ;;  %20 = sbr.rel (!%p18_p6) target bundleno = 10 (0xa), region = 109 }
 0x1e4   :  { %826 = vsyncpa [#allocation4], 1 }
 0x1e5   :  { %828 = vsyncpa [#allocation4 + $0x1], 1 }
 0x1e6   :  { %829 = vsyncpa [#allocation7], 1 }
 0x1e7   :  { %831 = vsyncpa [#allocation7 + $0x1], 1 }
 0x1e8   :  { %832 = vsyncpa [#allocation5], 1 }
 0x1e9   :  { %834 = vsyncpa [#allocation5 + $0x1], 1 }

</bundles_post_ra>
